<compile_context>
chip_gen: v6e
topology: v6e:2x2x1
jax: 0.10.0
libtpu: 0.0.40
codegen_flags: <defaults>
</compile_context>

<pallas_src>
import functools

import jax
import jax.numpy as jnp
import numpy as np
from jax.experimental import pallas as pl
from jax.experimental.pallas import tpu as pltpu


def conv3x3_relu_kernel(w_ref, x_ref, bias_ref, mask_ref, o_ref, *, img_w):
    """Whole batch in one invocation (no grid).

    w_ref:    (9, Cout, C)   per-tap conv weights for the state channels,
                             tap = kh*3 + kw (cross-correlation, padding=1)
    x_ref:    (B, C, HW)     state, spatial flattened onto the lane axis
    bias_ref: (Cout, HW)     precomputed time-channel contribution
    mask_ref: (9, HW)        0/1 border-validity mask per tap
    o_ref:    (B, Cout, HW)  ReLU(conv) output, lane-dense store
    """
    B, C, HW = x_ref.shape
    Cout = w_ref.shape[1]

    x = x_ref[...]          # (B, C, HW)
    w = w_ref[...]          # (9, Cout, C)
    masks = mask_ref[...]   # (9, HW)
    bias = bias_ref[...]    # (Cout, HW)

    # f32 register accumulators, one per batch element (B is small and static).
    accs = [jnp.zeros((Cout, HW), jnp.float32) for _ in range(B)]

    for kh in range(3):
        for kw in range(3):
            tap = kh * 3 + kw
            d = (kh - 1) * img_w + (kw - 1)   # flat input offset of this tap
            w_tap = w[tap]                    # (Cout, C)
            m = masks[tap]                    # (HW,)
            for b in range(B):
                xb = x[b]                     # (C, HW)
                # Output position p reads input position p + d (zero outside the
                # image): lane-rotate on the XLU, then border mask on the VPU.
                # Any wrap-around lands only on masked-out positions.
                sb = xb if d == 0 else pltpu.roll(xb, shift=(-d) % HW, axis=1)
                accs[b] = accs[b] + jnp.dot(
                    w_tap, sb * m, preferred_element_type=jnp.float32)

    for b in range(B):
        o_ref[b] = jnp.maximum(accs[b] + bias, 0.0).astype(o_ref.dtype)


def conv2d_node_forward(time, state, weight):
    """Pallas implementation of Conv2dNODE.forward.

    time:   scalar (shape () or (1,))
    state:  (B, C, H, W) float32, NCHW
    weight: (C, C+1, 3, 3) float32, OIHW (PyTorch Conv2d weight, bias=False)
    returns (B, C, H, W) float32  = ReLU(Conv2d([state; t], weight))
    """
    B, C, H, W = state.shape
    Cout, Cin, KH, KW = weight.shape
    assert (Cin, KH, KW) == (C + 1, 3, 3), "expected Conv2d(C+1 -> C, 3x3) weights"
    assert time.size == 1, "Conv2dNODE uses a single scalar time"
    HW = H * W

    t = jnp.reshape(time, ()).astype(jnp.float32)

    # Per-tap weights for the *state* channels only: (9, Cout, C), tap = kh*3 + kw.
    w_taps = jnp.transpose(weight[:, :C, :, :], (2, 3, 0, 1)).reshape(9, Cout, C)
    w_taps = w_taps.astype(jnp.float32)

    # ---- trace-time constants (pure numpy, zero runtime ops) ------------------
    iy, ix = np.arange(H), np.arange(W)
    vy = np.stack([(iy + kh - 1 >= 0) & (iy + kh - 1 < H) for kh in range(3)],
                  axis=1).astype(np.float32)                       # (H, 3)
    vx = np.stack([(ix + kw - 1 >= 0) & (ix + kw - 1 < W) for kw in range(3)],
                  axis=1).astype(np.float32)                       # (W, 3)
    p = np.arange(HW)
    yy, xx = p // W, p % W
    masks = np.stack(
        [((yy + kh - 1 >= 0) & (yy + kh - 1 < H) &
          (xx + kw - 1 >= 0) & (xx + kw - 1 < W)).astype(np.float32)
         for kh in range(3) for kw in range(3)], axis=0)           # (9, HW)
    masks = jnp.asarray(masks)

    # Time channel is a constant image, so its conv contribution is data independent:
    # bias[o, y, x] = t * sum_{kh,kw} weight[o, C, kh, kw] * vy[y, kh] * vx[x, kw]
    bias = t * jnp.einsum('yh,ohw,xw->oyx', vy,
                          weight[:, C, :, :].astype(jnp.float32), vx)
    bias = bias.reshape(Cout, HW)

    x = state.reshape(B, C, HW).astype(jnp.float32)                # free reshape

    kernel = functools.partial(conv3x3_relu_kernel, img_w=W)
    out = pl.pallas_call(
        kernel,
        out_shape=jax.ShapeDtypeStruct((B, Cout, HW), state.dtype),
        cost_estimate=pl.CostEstimate(
            flops=2 * B * Cout * 9 * C * HW,
            transcendentals=0,
            bytes_accessed=4 * (x.size + w_taps.size + bias.size
                                + masks.size + B * Cout * HW)),
    )(w_taps, x, bias, masks)

    # (B, Cout, HW) -> (B, Cout, H, W): pure reshape, no transpose.
    return out.reshape(B, Cout, H, W)


def _reference_forward(time, state, weight):
    """Pure-JAX reference (XLA conv) for the correctness check."""
    B, C, H, W = state.shape
    t = jnp.broadcast_to(jnp.reshape(time, (1, 1, 1, 1)).astype(state.dtype),
                         (B, 1, H, W))
    xcat = jnp.concatenate([state, t], axis=1)                     # NCHW
    h = jax.lax.conv_general_dilated(
        xcat, weight, window_strides=(1, 1), padding=((1, 1), (1, 1)),
        dimension_numbers=("NCHW", "OIHW", "NCHW"))
    return jnp.maximum(h, 0.0)


if __name__ == "__main__":
    # Small shapes consistent with the module: B=2, n_features=4, spatial=16.
    B, C, H, W = 2, 4, 16, 16

    key = jax.random.PRNGKey(0)
    k_state, k_weight, k_time = jax.random.split(key, 3)

    state = jax.random.normal(k_state, (B, C, H, W), dtype=jnp.float32)
    weight = jax.random.normal(k_weight, (C, C + 1, 3, 3), dtype=jnp.float32) * 0.1
    time = jax.random.uniform(k_time, (), dtype=jnp.float32)

    fwd = jax.jit(conv2d_node_forward)
    out = jax.block_until_ready(fwd(time, state, weight))
    ref = jax.block_until_ready(_reference_forward(time, state, weight))

    assert out.shape == (B, C, H, W)
    if not jnp.allclose(out, ref, rtol=1e-4, atol=1e-4):
        raise AssertionError("Pallas kernel output mismatch vs JAX reference")

    # TODO(synk): forward_with_grad / flatten_parameters (adjoint & costate dynamics
    # via torch.autograd.grad) are autodiff plumbing, not forward compute; in JAX
    # they correspond to jax.vjp around conv2d_node_forward, not extra kernel code.
    print("KERNEL_OK")
</pallas_src>

<mosaic_0001>
module attributes {stable_mosaic.version = 11 : i64} {
  func.func @conv3x3_relu_kernel(%arg0: memref<9x4x4xf32, #tpu.memory_space<vmem>>, %arg1: memref<2x4x256xf32, #tpu.memory_space<vmem>>, %arg2: memref<4x256xf32, #tpu.memory_space<vmem>>, %arg3: memref<9x256xf32, #tpu.memory_space<vmem>>, %arg4: memref<2x4x256xf32, #tpu.memory_space<vmem>>) attributes {dimension_semantics = [], scalar_prefetch = 0 : i64, scratch_operands = 0 : i64, tpu.core_type = #tpu.core_type<tc>} {
    %c0 = arith.constant 0 : index
    %c0_0 = arith.constant 0 : index
    %c0_1 = arith.constant 0 : index
    %0 = vector.load %arg1[%c0, %c0_0, %c0_1] : memref<2x4x256xf32, #tpu.memory_space<vmem>>, vector<2x4x256xf32>
    %c0_2 = arith.constant 0 : index
    %c0_3 = arith.constant 0 : index
    %c0_4 = arith.constant 0 : index
    %1 = vector.load %arg0[%c0_2, %c0_3, %c0_4] : memref<9x4x4xf32, #tpu.memory_space<vmem>>, vector<9x4x4xf32>
    %c0_5 = arith.constant 0 : index
    %c0_6 = arith.constant 0 : index
    %2 = vector.load %arg3[%c0_5, %c0_6] : memref<9x256xf32, #tpu.memory_space<vmem>>, vector<9x256xf32>
    %c0_7 = arith.constant 0 : index
    %c0_8 = arith.constant 0 : index
    %3 = vector.load %arg2[%c0_7, %c0_8] : memref<4x256xf32, #tpu.memory_space<vmem>>, vector<4x256xf32>
    %cst = arith.constant 0.000000e+00 : f32
    %4 = vector.broadcast %cst : f32 to vector<4x256xf32>
    %cst_9 = arith.constant 0.000000e+00 : f32
    %5 = vector.broadcast %cst_9 : f32 to vector<4x256xf32>
    %6 = vector.extract_strided_slice %1 {offsets = [0, 0, 0], sizes = [1, 4, 4], strides = [1, 1, 1]} : vector<9x4x4xf32> to vector<1x4x4xf32>
    %7 = vector.shape_cast %6 : vector<1x4x4xf32> to vector<4x4xf32>
    %8 = vector.extract_strided_slice %2 {offsets = [0, 0], sizes = [1, 256], strides = [1, 1]} : vector<9x256xf32> to vector<1x256xf32>
    %9 = vector.shape_cast %8 : vector<1x256xf32> to vector<256xf32>
    %10 = vector.extract_strided_slice %0 {offsets = [0, 0, 0], sizes = [1, 4, 256], strides = [1, 1, 1]} : vector<2x4x256xf32> to vector<1x4x256xf32>
    %11 = vector.shape_cast %10 : vector<1x4x256xf32> to vector<4x256xf32>
    %c17_i32 = arith.constant 17 : i32
    %12 = tpu.dynamic_rotate %11 by %c17_i32 dim 1 : vector<4x256xf32>, i32 -> vector<4x256xf32>
    %13 = vector.shape_cast %9 : vector<256xf32> to vector<1x256xf32>
    %14 = vector.broadcast %13 : vector<1x256xf32> to vector<4x256xf32>
    %15 = arith.mulf %12, %14 : vector<4x256xf32>
    %cst_10 = arith.constant dense<0.000000e+00> : vector<4x256xf32>
    %16 = tpu.matmul %7, %15, %cst_10 {dimension_numbers = #tpu.dot_dimension_numbers<[1], [0], [0], [1], [0, 0, 1, 1], [], []>} : vector<4x4xf32>, vector<4x256xf32>, vector<4x256xf32> -> vector<4x256xf32>
    %17 = arith.addf %4, %16 : vector<4x256xf32>
    %18 = vector.extract_strided_slice %0 {offsets = [1, 0, 0], sizes = [1, 4, 256], strides = [1, 1, 1]} : vector<2x4x256xf32> to vector<1x4x256xf32>
    %19 = vector.shape_cast %18 : vector<1x4x256xf32> to vector<4x256xf32>
    %c17_i32_11 = arith.constant 17 : i32
    %20 = tpu.dynamic_rotate %19 by %c17_i32_11 dim 1 : vector<4x256xf32>, i32 -> vector<4x256xf32>
    %21 = vector.shape_cast %9 : vector<256xf32> to vector<1x256xf32>
    %22 = vector.broadcast %21 : vector<1x256xf32> to vector<4x256xf32>
    %23 = arith.mulf %20, %22 : vector<4x256xf32>
    %cst_12 = arith.constant dense<0.000000e+00> : vector<4x256xf32>
    %24 = tpu.matmul %7, %23, %cst_12 {dimension_numbers = #tpu.dot_dimension_numbers<[1], [0], [0], [1], [0, 0, 1, 1], [], []>} : vector<4x4xf32>, vector<4x256xf32>, vector<4x256xf32> -> vector<4x256xf32>
    %25 = arith.addf %5, %24 : vector<4x256xf32>
    %26 = vector.extract_strided_slice %1 {offsets = [1, 0, 0], sizes = [1, 4, 4], strides = [1, 1, 1]} : vector<9x4x4xf32> to vector<1x4x4xf32>
    %27 = vector.shape_cast %26 : vector<1x4x4xf32> to vector<4x4xf32>
    %28 = vector.extract_strided_slice %2 {offsets = [1, 0], sizes = [1, 256], strides = [1, 1]} : vector<9x256xf32> to vector<1x256xf32>
    %29 = vector.shape_cast %28 : vector<1x256xf32> to vector<256xf32>
    %30 = vector.extract_strided_slice %0 {offsets = [0, 0, 0], sizes = [1, 4, 256], strides = [1, 1, 1]} : vector<2x4x256xf32> to vector<1x4x256xf32>
    %31 = vector.shape_cast %30 : vector<1x4x256xf32> to vector<4x256xf32>
    %c16_i32 = arith.constant 16 : i32
    %32 = tpu.dynamic_rotate %31 by %c16_i32 dim 1 : vector<4x256xf32>, i32 -> vector<4x256xf32>
    %33 = vector.shape_cast %29 : vector<256xf32> to vector<1x256xf32>
    %34 = vector.broadcast %33 : vector<1x256xf32> to vector<4x256xf32>
    %35 = arith.mulf %32, %34 : vector<4x256xf32>
    %cst_13 = arith.constant dense<0.000000e+00> : vector<4x256xf32>
    %36 = tpu.matmul %27, %35, %cst_13 {dimension_numbers = #tpu.dot_dimension_numbers<[1], [0], [0], [1], [0, 0, 1, 1], [], []>} : vector<4x4xf32>, vector<4x256xf32>, vector<4x256xf32> -> vector<4x256xf32>
    %37 = arith.addf %17, %36 : vector<4x256xf32>
    %38 = vector.extract_strided_slice %0 {offsets = [1, 0, 0], sizes = [1, 4, 256], strides = [1, 1, 1]} : vector<2x4x256xf32> to vector<1x4x256xf32>
    %39 = vector.shape_cast %38 : vector<1x4x256xf32> to vector<4x256xf32>
    %c16_i32_14 = arith.constant 16 : i32
    %40 = tpu.dynamic_rotate %39 by %c16_i32_14 dim 1 : vector<4x256xf32>, i32 -> vector<4x256xf32>
    %41 = vector.shape_cast %29 : vector<256xf32> to vector<1x256xf32>
    %42 = vector.broadcast %41 : vector<1x256xf32> to vector<4x256xf32>
    %43 = arith.mulf %40, %42 : vector<4x256xf32>
    %cst_15 = arith.constant dense<0.000000e+00> : vector<4x256xf32>
    %44 = tpu.matmul %27, %43, %cst_15 {dimension_numbers = #tpu.dot_dimension_numbers<[1], [0], [0], [1], [0, 0, 1, 1], [], []>} : vector<4x4xf32>, vector<4x256xf32>, vector<4x256xf32> -> vector<4x256xf32>
    %45 = arith.addf %25, %44 : vector<4x256xf32>
    %46 = vector.extract_strided_slice %1 {offsets = [2, 0, 0], sizes = [1, 4, 4], strides = [1, 1, 1]} : vector<9x4x4xf32> to vector<1x4x4xf32>
    %47 = vector.shape_cast %46 : vector<1x4x4xf32> to vector<4x4xf32>
    %48 = vector.extract_strided_slice %2 {offsets = [2, 0], sizes = [1, 256], strides = [1, 1]} : vector<9x256xf32> to vector<1x256xf32>
    %49 = vector.shape_cast %48 : vector<1x256xf32> to vector<256xf32>
    %50 = vector.extract_strided_slice %0 {offsets = [0, 0, 0], sizes = [1, 4, 256], strides = [1, 1, 1]} : vector<2x4x256xf32> to vector<1x4x256xf32>
    %51 = vector.shape_cast %50 : vector<1x4x256xf32> to vector<4x256xf32>
    %c15_i32 = arith.constant 15 : i32
    %52 = tpu.dynamic_rotate %51 by %c15_i32 dim 1 : vector<4x256xf32>, i32 -> vector<4x256xf32>
    %53 = vector.shape_cast %49 : vector<256xf32> to vector<1x256xf32>
    %54 = vector.broadcast %53 : vector<1x256xf32> to vector<4x256xf32>
    %55 = arith.mulf %52, %54 : vector<4x256xf32>
    %cst_16 = arith.constant dense<0.000000e+00> : vector<4x256xf32>
    %56 = tpu.matmul %47, %55, %cst_16 {dimension_numbers = #tpu.dot_dimension_numbers<[1], [0], [0], [1], [0, 0, 1, 1], [], []>} : vector<4x4xf32>, vector<4x256xf32>, vector<4x256xf32> -> vector<4x256xf32>
    %57 = arith.addf %37, %56 : vector<4x256xf32>
    %58 = vector.extract_strided_slice %0 {offsets = [1, 0, 0], sizes = [1, 4, 256], strides = [1, 1, 1]} : vector<2x4x256xf32> to vector<1x4x256xf32>
    %59 = vector.shape_cast %58 : vector<1x4x256xf32> to vector<4x256xf32>
    %c15_i32_17 = arith.constant 15 : i32
    %60 = tpu.dynamic_rotate %59 by %c15_i32_17 dim 1 : vector<4x256xf32>, i32 -> vector<4x256xf32>
    %61 = vector.shape_cast %49 : vector<256xf32> to vector<1x256xf32>
    %62 = vector.broadcast %61 : vector<1x256xf32> to vector<4x256xf32>
    %63 = arith.mulf %60, %62 : vector<4x256xf32>
    %cst_18 = arith.constant dense<0.000000e+00> : vector<4x256xf32>
    %64 = tpu.matmul %47, %63, %cst_18 {dimension_numbers = #tpu.dot_dimension_numbers<[1], [0], [0], [1], [0, 0, 1, 1], [], []>} : vector<4x4xf32>, vector<4x256xf32>, vector<4x256xf32> -> vector<4x256xf32>
    %65 = arith.addf %45, %64 : vector<4x256xf32>
    %66 = vector.extract_strided_slice %1 {offsets = [3, 0, 0], sizes = [1, 4, 4], strides = [1, 1, 1]} : vector<9x4x4xf32> to vector<1x4x4xf32>
    %67 = vector.shape_cast %66 : vector<1x4x4xf32> to vector<4x4xf32>
    %68 = vector.extract_strided_slice %2 {offsets = [3, 0], sizes = [1, 256], strides = [1, 1]} : vector<9x256xf32> to vector<1x256xf32>
    %69 = vector.shape_cast %68 : vector<1x256xf32> to vector<256xf32>
    %70 = vector.extract_strided_slice %0 {offsets = [0, 0, 0], sizes = [1, 4, 256], strides = [1, 1, 1]} : vector<2x4x256xf32> to vector<1x4x256xf32>
    %71 = vector.shape_cast %70 : vector<1x4x256xf32> to vector<4x256xf32>
    %c1_i32 = arith.constant 1 : i32
    %72 = tpu.dynamic_rotate %71 by %c1_i32 dim 1 : vector<4x256xf32>, i32 -> vector<4x256xf32>
    %73 = vector.shape_cast %69 : vector<256xf32> to vector<1x256xf32>
    %74 = vector.broadcast %73 : vector<1x256xf32> to vector<4x256xf32>
    %75 = arith.mulf %72, %74 : vector<4x256xf32>
    %cst_19 = arith.constant dense<0.000000e+00> : vector<4x256xf32>
    %76 = tpu.matmul %67, %75, %cst_19 {dimension_numbers = #tpu.dot_dimension_numbers<[1], [0], [0], [1], [0, 0, 1, 1], [], []>} : vector<4x4xf32>, vector<4x256xf32>, vector<4x256xf32> -> vector<4x256xf32>
    %77 = arith.addf %57, %76 : vector<4x256xf32>
    %78 = vector.extract_strided_slice %0 {offsets = [1, 0, 0], sizes = [1, 4, 256], strides = [1, 1, 1]} : vector<2x4x256xf32> to vector<1x4x256xf32>
    %79 = vector.shape_cast %78 : vector<1x4x256xf32> to vector<4x256xf32>
    %c1_i32_20 = arith.constant 1 : i32
    %80 = tpu.dynamic_rotate %79 by %c1_i32_20 dim 1 : vector<4x256xf32>, i32 -> vector<4x256xf32>
    %81 = vector.shape_cast %69 : vector<256xf32> to vector<1x256xf32>
    %82 = vector.broadcast %81 : vector<1x256xf32> to vector<4x256xf32>
    %83 = arith.mulf %80, %82 : vector<4x256xf32>
    %cst_21 = arith.constant dense<0.000000e+00> : vector<4x256xf32>
    %84 = tpu.matmul %67, %83, %cst_21 {dimension_numbers = #tpu.dot_dimension_numbers<[1], [0], [0], [1], [0, 0, 1, 1], [], []>} : vector<4x4xf32>, vector<4x256xf32>, vector<4x256xf32> -> vector<4x256xf32>
    %85 = arith.addf %65, %84 : vector<4x256xf32>
    %86 = vector.extract_strided_slice %1 {offsets = [4, 0, 0], sizes = [1, 4, 4], strides = [1, 1, 1]} : vector<9x4x4xf32> to vector<1x4x4xf32>
    %87 = vector.shape_cast %86 : vector<1x4x4xf32> to vector<4x4xf32>
    %88 = vector.extract_strided_slice %2 {offsets = [4, 0], sizes = [1, 256], strides = [1, 1]} : vector<9x256xf32> to vector<1x256xf32>
    %89 = vector.shape_cast %88 : vector<1x256xf32> to vector<256xf32>
    %90 = vector.extract_strided_slice %0 {offsets = [0, 0, 0], sizes = [1, 4, 256], strides = [1, 1, 1]} : vector<2x4x256xf32> to vector<1x4x256xf32>
    %91 = vector.shape_cast %90 : vector<1x4x256xf32> to vector<4x256xf32>
    %92 = vector.shape_cast %89 : vector<256xf32> to vector<1x256xf32>
    %93 = vector.broadcast %92 : vector<1x256xf32> to vector<4x256xf32>
    %94 = arith.mulf %91, %93 : vector<4x256xf32>
    %cst_22 = arith.constant dense<0.000000e+00> : vector<4x256xf32>
    %95 = tpu.matmul %87, %94, %cst_22 {dimension_numbers = #tpu.dot_dimension_numbers<[1], [0], [0], [1], [0, 0, 1, 1], [], []>} : vector<4x4xf32>, vector<4x256xf32>, vector<4x256xf32> -> vector<4x256xf32>
    %96 = arith.addf %77, %95 : vector<4x256xf32>
    %97 = vector.extract_strided_slice %0 {offsets = [1, 0, 0], sizes = [1, 4, 256], strides = [1, 1, 1]} : vector<2x4x256xf32> to vector<1x4x256xf32>
    %98 = vector.shape_cast %97 : vector<1x4x256xf32> to vector<4x256xf32>
    %99 = vector.shape_cast %89 : vector<256xf32> to vector<1x256xf32>
    %100 = vector.broadcast %99 : vector<1x256xf32> to vector<4x256xf32>
    %101 = arith.mulf %98, %100 : vector<4x256xf32>
    %cst_23 = arith.constant dense<0.000000e+00> : vector<4x256xf32>
    %102 = tpu.matmul %87, %101, %cst_23 {dimension_numbers = #tpu.dot_dimension_numbers<[1], [0], [0], [1], [0, 0, 1, 1], [], []>} : vector<4x4xf32>, vector<4x256xf32>, vector<4x256xf32> -> vector<4x256xf32>
    %103 = arith.addf %85, %102 : vector<4x256xf32>
    %104 = vector.extract_strided_slice %1 {offsets = [5, 0, 0], sizes = [1, 4, 4], strides = [1, 1, 1]} : vector<9x4x4xf32> to vector<1x4x4xf32>
    %105 = vector.shape_cast %104 : vector<1x4x4xf32> to vector<4x4xf32>
    %106 = vector.extract_strided_slice %2 {offsets = [5, 0], sizes = [1, 256], strides = [1, 1]} : vector<9x256xf32> to vector<1x256xf32>
    %107 = vector.shape_cast %106 : vector<1x256xf32> to vector<256xf32>
    %108 = vector.extract_strided_slice %0 {offsets = [0, 0, 0], sizes = [1, 4, 256], strides = [1, 1, 1]} : vector<2x4x256xf32> to vector<1x4x256xf32>
    %109 = vector.shape_cast %108 : vector<1x4x256xf32> to vector<4x256xf32>
    %c255_i32 = arith.constant 255 : i32
    %110 = tpu.dynamic_rotate %109 by %c255_i32 dim 1 : vector<4x256xf32>, i32 -> vector<4x256xf32>
    %111 = vector.shape_cast %107 : vector<256xf32> to vector<1x256xf32>
    %112 = vector.broadcast %111 : vector<1x256xf32> to vector<4x256xf32>
    %113 = arith.mulf %110, %112 : vector<4x256xf32>
    %cst_24 = arith.constant dense<0.000000e+00> : vector<4x256xf32>
    %114 = tpu.matmul %105, %113, %cst_24 {dimension_numbers = #tpu.dot_dimension_numbers<[1], [0], [0], [1], [0, 0, 1, 1], [], []>} : vector<4x4xf32>, vector<4x256xf32>, vector<4x256xf32> -> vector<4x256xf32>
    %115 = arith.addf %96, %114 : vector<4x256xf32>
    %116 = vector.extract_strided_slice %0 {offsets = [1, 0, 0], sizes = [1, 4, 256], strides = [1, 1, 1]} : vector<2x4x256xf32> to vector<1x4x256xf32>
    %117 = vector.shape_cast %116 : vector<1x4x256xf32> to vector<4x256xf32>
    %c255_i32_25 = arith.constant 255 : i32
    %118 = tpu.dynamic_rotate %117 by %c255_i32_25 dim 1 : vector<4x256xf32>, i32 -> vector<4x256xf32>
    %119 = vector.shape_cast %107 : vector<256xf32> to vector<1x256xf32>
    %120 = vector.broadcast %119 : vector<1x256xf32> to vector<4x256xf32>
    %121 = arith.mulf %118, %120 : vector<4x256xf32>
    %cst_26 = arith.constant dense<0.000000e+00> : vector<4x256xf32>
    %122 = tpu.matmul %105, %121, %cst_26 {dimension_numbers = #tpu.dot_dimension_numbers<[1], [0], [0], [1], [0, 0, 1, 1], [], []>} : vector<4x4xf32>, vector<4x256xf32>, vector<4x256xf32> -> vector<4x256xf32>
    %123 = arith.addf %103, %122 : vector<4x256xf32>
    %124 = vector.extract_strided_slice %1 {offsets = [6, 0, 0], sizes = [1, 4, 4], strides = [1, 1, 1]} : vector<9x4x4xf32> to vector<1x4x4xf32>
    %125 = vector.shape_cast %124 : vector<1x4x4xf32> to vector<4x4xf32>
    %126 = vector.extract_strided_slice %2 {offsets = [6, 0], sizes = [1, 256], strides = [1, 1]} : vector<9x256xf32> to vector<1x256xf32>
    %127 = vector.shape_cast %126 : vector<1x256xf32> to vector<256xf32>
    %128 = vector.extract_strided_slice %0 {offsets = [0, 0, 0], sizes = [1, 4, 256], strides = [1, 1, 1]} : vector<2x4x256xf32> to vector<1x4x256xf32>
    %129 = vector.shape_cast %128 : vector<1x4x256xf32> to vector<4x256xf32>
    %c241_i32 = arith.constant 241 : i32
    %130 = tpu.dynamic_rotate %129 by %c241_i32 dim 1 : vector<4x256xf32>, i32 -> vector<4x256xf32>
    %131 = vector.shape_cast %127 : vector<256xf32> to vector<1x256xf32>
    %132 = vector.broadcast %131 : vector<1x256xf32> to vector<4x256xf32>
    %133 = arith.mulf %130, %132 : vector<4x256xf32>
    %cst_27 = arith.constant dense<0.000000e+00> : vector<4x256xf32>
    %134 = tpu.matmul %125, %133, %cst_27 {dimension_numbers = #tpu.dot_dimension_numbers<[1], [0], [0], [1], [0, 0, 1, 1], [], []>} : vector<4x4xf32>, vector<4x256xf32>, vector<4x256xf32> -> vector<4x256xf32>
    %135 = arith.addf %115, %134 : vector<4x256xf32>
    %136 = vector.extract_strided_slice %0 {offsets = [1, 0, 0], sizes = [1, 4, 256], strides = [1, 1, 1]} : vector<2x4x256xf32> to vector<1x4x256xf32>
    %137 = vector.shape_cast %136 : vector<1x4x256xf32> to vector<4x256xf32>
    %c241_i32_28 = arith.constant 241 : i32
    %138 = tpu.dynamic_rotate %137 by %c241_i32_28 dim 1 : vector<4x256xf32>, i32 -> vector<4x256xf32>
    %139 = vector.shape_cast %127 : vector<256xf32> to vector<1x256xf32>
    %140 = vector.broadcast %139 : vector<1x256xf32> to vector<4x256xf32>
    %141 = arith.mulf %138, %140 : vector<4x256xf32>
    %cst_29 = arith.constant dense<0.000000e+00> : vector<4x256xf32>
    %142 = tpu.matmul %125, %141, %cst_29 {dimension_numbers = #tpu.dot_dimension_numbers<[1], [0], [0], [1], [0, 0, 1, 1], [], []>} : vector<4x4xf32>, vector<4x256xf32>, vector<4x256xf32> -> vector<4x256xf32>
    %143 = arith.addf %123, %142 : vector<4x256xf32>
    %144 = vector.extract_strided_slice %1 {offsets = [7, 0, 0], sizes = [1, 4, 4], strides = [1, 1, 1]} : vector<9x4x4xf32> to vector<1x4x4xf32>
    %145 = vector.shape_cast %144 : vector<1x4x4xf32> to vector<4x4xf32>
    %146 = vector.extract_strided_slice %2 {offsets = [7, 0], sizes = [1, 256], strides = [1, 1]} : vector<9x256xf32> to vector<1x256xf32>
    %147 = vector.shape_cast %146 : vector<1x256xf32> to vector<256xf32>
    %148 = vector.extract_strided_slice %0 {offsets = [0, 0, 0], sizes = [1, 4, 256], strides = [1, 1, 1]} : vector<2x4x256xf32> to vector<1x4x256xf32>
    %149 = vector.shape_cast %148 : vector<1x4x256xf32> to vector<4x256xf32>
    %c240_i32 = arith.constant 240 : i32
    %150 = tpu.dynamic_rotate %149 by %c240_i32 dim 1 : vector<4x256xf32>, i32 -> vector<4x256xf32>
    %151 = vector.shape_cast %147 : vector<256xf32> to vector<1x256xf32>
    %152 = vector.broadcast %151 : vector<1x256xf32> to vector<4x256xf32>
    %153 = arith.mulf %150, %152 : vector<4x256xf32>
    %cst_30 = arith.constant dense<0.000000e+00> : vector<4x256xf32>
    %154 = tpu.matmul %145, %153, %cst_30 {dimension_numbers = #tpu.dot_dimension_numbers<[1], [0], [0], [1], [0, 0, 1, 1], [], []>} : vector<4x4xf32>, vector<4x256xf32>, vector<4x256xf32> -> vector<4x256xf32>
    %155 = arith.addf %135, %154 : vector<4x256xf32>
    %156 = vector.extract_strided_slice %0 {offsets = [1, 0, 0], sizes = [1, 4, 256], strides = [1, 1, 1]} : vector<2x4x256xf32> to vector<1x4x256xf32>
    %157 = vector.shape_cast %156 : vector<1x4x256xf32> to vector<4x256xf32>
    %c240_i32_31 = arith.constant 240 : i32
    %158 = tpu.dynamic_rotate %157 by %c240_i32_31 dim 1 : vector<4x256xf32>, i32 -> vector<4x256xf32>
    %159 = vector.shape_cast %147 : vector<256xf32> to vector<1x256xf32>
    %160 = vector.broadcast %159 : vector<1x256xf32> to vector<4x256xf32>
    %161 = arith.mulf %158, %160 : vector<4x256xf32>
    %cst_32 = arith.constant dense<0.000000e+00> : vector<4x256xf32>
    %162 = tpu.matmul %145, %161, %cst_32 {dimension_numbers = #tpu.dot_dimension_numbers<[1], [0], [0], [1], [0, 0, 1, 1], [], []>} : vector<4x4xf32>, vector<4x256xf32>, vector<4x256xf32> -> vector<4x256xf32>
    %163 = arith.addf %143, %162 : vector<4x256xf32>
    %164 = vector.extract_strided_slice %1 {offsets = [8, 0, 0], sizes = [1, 4, 4], strides = [1, 1, 1]} : vector<9x4x4xf32> to vector<1x4x4xf32>
    %165 = vector.shape_cast %164 : vector<1x4x4xf32> to vector<4x4xf32>
    %166 = vector.extract_strided_slice %2 {offsets = [8, 0], sizes = [1, 256], strides = [1, 1]} : vector<9x256xf32> to vector<1x256xf32>
    %167 = vector.shape_cast %166 : vector<1x256xf32> to vector<256xf32>
    %168 = vector.extract_strided_slice %0 {offsets = [0, 0, 0], sizes = [1, 4, 256], strides = [1, 1, 1]} : vector<2x4x256xf32> to vector<1x4x256xf32>
    %169 = vector.shape_cast %168 : vector<1x4x256xf32> to vector<4x256xf32>
    %c239_i32 = arith.constant 239 : i32
    %170 = tpu.dynamic_rotate %169 by %c239_i32 dim 1 : vector<4x256xf32>, i32 -> vector<4x256xf32>
    %171 = vector.shape_cast %167 : vector<256xf32> to vector<1x256xf32>
    %172 = vector.broadcast %171 : vector<1x256xf32> to vector<4x256xf32>
    %173 = arith.mulf %170, %172 : vector<4x256xf32>
    %cst_33 = arith.constant dense<0.000000e+00> : vector<4x256xf32>
    %174 = tpu.matmul %165, %173, %cst_33 {dimension_numbers = #tpu.dot_dimension_numbers<[1], [0], [0], [1], [0, 0, 1, 1], [], []>} : vector<4x4xf32>, vector<4x256xf32>, vector<4x256xf32> -> vector<4x256xf32>
    %175 = arith.addf %155, %174 : vector<4x256xf32>
    %176 = vector.extract_strided_slice %0 {offsets = [1, 0, 0], sizes = [1, 4, 256], strides = [1, 1, 1]} : vector<2x4x256xf32> to vector<1x4x256xf32>
    %177 = vector.shape_cast %176 : vector<1x4x256xf32> to vector<4x256xf32>
    %c239_i32_34 = arith.constant 239 : i32
    %178 = tpu.dynamic_rotate %177 by %c239_i32_34 dim 1 : vector<4x256xf32>, i32 -> vector<4x256xf32>
    %179 = vector.shape_cast %167 : vector<256xf32> to vector<1x256xf32>
    %180 = vector.broadcast %179 : vector<1x256xf32> to vector<4x256xf32>
    %181 = arith.mulf %178, %180 : vector<4x256xf32>
    %cst_35 = arith.constant dense<0.000000e+00> : vector<4x256xf32>
    %182 = tpu.matmul %165, %181, %cst_35 {dimension_numbers = #tpu.dot_dimension_numbers<[1], [0], [0], [1], [0, 0, 1, 1], [], []>} : vector<4x4xf32>, vector<4x256xf32>, vector<4x256xf32> -> vector<4x256xf32>
    %183 = arith.addf %163, %182 : vector<4x256xf32>
    %184 = arith.addf %175, %3 : vector<4x256xf32>
    %cst_36 = arith.constant 0.000000e+00 : f32
    %185 = vector.broadcast %cst_36 : f32 to vector<4x256xf32>
    %186 = arith.maximumf %184, %185 : vector<4x256xf32>
    %c0_37 = arith.constant 0 : index
    %c0_38 = arith.constant 0 : index
    %c0_39 = arith.constant 0 : index
    %187 = vector.load %arg4[%c0_37, %c0_38, %c0_39] : memref<2x4x256xf32, #tpu.memory_space<vmem>>, vector<1x4x256xf32>
    %188 = vector.shape_cast %187 : vector<1x4x256xf32> to vector<4x256xf32>
    %189 = vector.shape_cast %186 : vector<4x256xf32> to vector<1x4x256xf32>
    tpu.vector_store %arg4[%c0_37, %c0_38, %c0_39], %189 {strides = array<i32>} : memref<2x4x256xf32, #tpu.memory_space<vmem>>, vector<1x4x256xf32>,
    %190 = arith.addf %183, %3 : vector<4x256xf32>
    %cst_40 = arith.constant 0.000000e+00 : f32
    %191 = vector.broadcast %cst_40 : f32 to vector<4x256xf32>
    %192 = arith.maximumf %190, %191 : vector<4x256xf32>
    %c1 = arith.constant 1 : index
    %c0_41 = arith.constant 0 : index
    %c0_42 = arith.constant 0 : index
    %193 = vector.load %arg4[%c1, %c0_41, %c0_42] : memref<2x4x256xf32, #tpu.memory_space<vmem>>, vector<1x4x256xf32>
    %194 = vector.shape_cast %193 : vector<1x4x256xf32> to vector<4x256xf32>
    %195 = vector.shape_cast %192 : vector<4x256xf32> to vector<1x4x256xf32>
    tpu.vector_store %arg4[%c1, %c0_41, %c0_42], %195 {strides = array<i32>} : memref<2x4x256xf32, #tpu.memory_space<vmem>>, vector<1x4x256xf32>,
    return
  }
}

</mosaic_0001>

<bundles_post_ra>
// kernel: conv2d_node_forward.1
= control target key start
LH: loop header
LB: loop body
LE: loop exit
PB: predicated region body
PF: predicated region fallthrough
CT: control target
= control target key end

     0   :  { %v1793_v1 = vmov 0.0   ;;  %s1794_s17 = smov 16   ;;  %s1795_s18 = smov 17   ;;  %v40_v5 = vlaneseq  ;;  %vm87_vm2 = vcmask 1043456   ;;  %vm83_vm3 = vcmask 31744   ;;  %s2083_s1 = inlined_call_operand.vmem [shape: f32[2,4,256], index: 1, kind: input, shape index: {}]   ;;  %s2084_s3 = inlined_call_operand.vmem [shape: f32[9,256], index: 3, kind: input, shape index: {}]   ;;  %s2085_s0 = inlined_call_operand.vmem [shape: f32[9,4,4], index: 0, kind: input, shape index: {}]   ;;  %s2086_s2 = inlined_call_operand.vmem [shape: f32[4,256], index: 2, kind: input, shape index: {}]   ;;  %s2087_s4 = inlined_call_operand.vmem [shape: f32[2,4,256], index: 4, kind: output, shape index: {}]  }
   0x1   :  { %v1830_v0 = vld [vmem:[%s2083_s1] sm:$0xff]  ;;  %238 = vmatprep.mubr.f32.mxu1 %v1793_v1  ;;  %158 = vmatprep.mubr.f32.mxu0 %v1793_v1  ;;  %v1841_v3 = vld [vmem:[%s2083_s1 + $0x8] sm:$0xff]  ;;  %s1796_s21 = smov 15   ;;  %s1797_s1 = smov 1  }
   0x2   :  { %66 = vrot.lane.b32.xlu1 %v1830_v0, %s1794_s17  ;;  %36 = vrot.lane.b32.xlu0 %v1830_v0, %s1795_s18  ;;  %v34_v2 = vcombine.high %v1830_v0, %v1830_v0  ;;  %v56_v4 = vcombine.high %v1841_v3, %v1841_v3  ;;  %s1798_s22 = smov 127   ;;  %s1799_s23 = smov 113   ;;  %v1859_v6 = vshrl.u32 %v40_v5, 7  ;;  %v1861_v7 = vand.u32 127, %v40_v5  ;;  %v1868_v10 = vld [vmem:[%s2084_s3] sm:$0xff]  ;;  %v1873_v11 = vld [vmem:[%s2084_s3 + $0x8] sm:$0xff] }
   0x3   :  { %s1800_s24 = smov 112   ;;  %s1801_s25 = smov 111   ;;  %v19_v28 = vld [vmem:[%s2085_s0] sm:$0xf]  ;;  %v20_v29 = vld [vmem:[%s2085_s0 + $0x4] sm:$0xf] }
   0x4   :  { %v75_v8 = vsub.s32 1, %v1859_v6  ;;  %v47_v9 = vsub.s32 0, %v1859_v6  ;;  %vm70_vm0 = vcmp.lt.s32.totalorder %v1861_v7, 16  ;;  %vm42_vm1 = vcmp.lt.s32.totalorder %v1861_v7, 17  ;;  %v21_v56 = vld [vmem:[%s2085_s0 + $0x8] sm:$0xf] }
   0x5   :  { %v416_v34 = vsub.s32 2, %v1859_v6  ;;  %v781_v37 = vsub.s32 4, %v1859_v6  ;;  %vm411_vm4 = vcmp.lt.s32.totalorder %v1861_v7, 15  ;;  %v602_v52 = vsub.s32 3, %v1859_v6 }
   0x6   :  { %68 = vrot.lane.b32.xlu1 %v34_v2, %s1794_s17  ;;  %38 = vrot.lane.b32.xlu0 %v34_v2, %s1795_s18  ;;  %v76_v14 = vrot.slane %v1868_v10, %v75_v8  ;;  %v48_v15 = vrot.slane %v1868_v10, %v47_v9  ;;  %v80_v16 = vrot.slane %v1873_v11, %v75_v8  ;;  %vm597_vm5 = vcmp.lt.s32.totalorder %v1861_v7, 1 }
   0x7   :  { %v52_v17 = vrot.slane %v1873_v11, %v47_v9  ;;  %v417_v42 = vrot.slane %v1868_v10, %v416_v34  ;;  %v421_v43 = vrot.slane %v1873_v11, %v416_v34  ;;  %v782_v46 = vrot.slane %v1868_v10, %v781_v37  ;;  %v24_v34 = vld [vmem:[%s2085_s0 + $0x14] sm:$0xf] }
   0x8   :  { %v786_v47 = vrot.slane %v1873_v11, %v781_v37  ;;  %v603_v61 = vrot.slane %v1868_v10, %v602_v52  ;;  %vm958_vm6 = vcmp.lt.s32.totalorder %v1861_v7, 127  ;;  %vm1144_vm7 = vcmp.lt.s32.totalorder %v1861_v7, 113 }
   0x9   :  { %vm1330_vm8 = vcmp.lt.s32.totalorder %v1861_v7, 112  ;;  %vm1516_vm9 = vcmp.lt.s32.totalorder %v1861_v7, 111 }
   0xa   :  { %60 = vrot.lane.b32.xlu1 %v56_v4, %s1795_s18  ;;  %58 = vrot.lane.b32.xlu0 %v1841_v3, %s1795_s18  ;;  %v789_v55 = vcombine.low %v782_v46, %v786_v47 }
   0xe   :  { %247 = vrot.lane.b32.xlu1 %v56_v4, %s1794_s17  ;;  %245 = vrot.lane.b32.xlu0 %v1841_v3, %s1794_s17 }
  0x12   :  { %409 = vrot.lane.b32.xlu1 %v34_v2, %s1796_s21  ;;  %407 = vrot.lane.b32.xlu0 %v1830_v0, %s1796_s21 }
  0x16   :  { %508 = vrot.lane.b32.xlu1 %v56_v4, %s1796_s21  ;;  %506 = vrot.lane.b32.xlu0 %v1841_v3, %s1796_s21 }
  0x1a   :  { %595 = vrot.lane.b32.xlu1 %v34_v2, %s1797_s1  ;;  %593 = vrot.lane.b32.xlu0 %v1830_v0, %s1797_s1 }
  0x1e   :  { %694 = vrot.lane.b32.xlu1 %v56_v4, %s1797_s1  ;;  %692 = vrot.lane.b32.xlu0 %v1841_v3, %s1797_s1 }
  0x22   :  { %956 = vrot.lane.b32.xlu1 %v34_v2, %s1798_s22  ;;  %954 = vrot.lane.b32.xlu0 %v1830_v0, %s1798_s22 }
  0x26   :  { %1055 = vrot.lane.b32.xlu1 %v56_v4, %s1798_s22  ;;  %1053 = vrot.lane.b32.xlu0 %v1841_v3, %s1798_s22 }
  0x2a   :  { %1142 = vrot.lane.b32.xlu1 %v34_v2, %s1799_s23  ;;  %1140 = vrot.lane.b32.xlu0 %v1830_v0, %s1799_s23 }
  0x2e   :  { %1241 = vrot.lane.b32.xlu1 %v56_v4, %s1799_s23  ;;  %1239 = vrot.lane.b32.xlu0 %v1841_v3, %s1799_s23 }
  0x32   :  { %1328 = vrot.lane.b32.xlu1 %v34_v2, %s1800_s24  ;;  %1326 = vrot.lane.b32.xlu0 %v1830_v0, %s1800_s24 }
  0x36   :  { %1427 = vrot.lane.b32.xlu1 %v56_v4, %s1800_s24  ;;  %1425 = vrot.lane.b32.xlu0 %v1841_v3, %s1800_s24 }
  0x3a   :  { %1514 = vrot.lane.b32.xlu1 %v34_v2, %s1801_s25  ;;  %1512 = vrot.lane.b32.xlu0 %v1830_v0, %s1801_s25  ;;  %v607_v2 = vrot.slane %v1873_v11, %v602_v52 }
  0x3e   :  { %1613 = vrot.lane.b32.xlu1 %v56_v4, %s1801_s25  ;;  %1611 = vrot.lane.b32.xlu0 %v1841_v3, %s1801_s25  ;;  %v791_v4 = vmul.f32 %v789_v55, %v1830_v0 }
  0x40   :  { %v793_v0 = vcombine.high %v791_v4, %v791_v4 }
  0x74   :  { %v67_v12 = vpop.permute.xlu1 %66  ;;  %v37_v13 = vpop.permute.xlu0 %36 }
  0x78   :  { %v69_v18 = vpop.permute.xlu1 %68  ;;  %v39_v19 = vpop.permute.xlu0 %38 }
  0x79   :  { %v71_v20 = vsel %vm70_vm0, %v67_v12, %v69_v18  ;;  %v72_v21 = vsel %vm70_vm0, %v69_v18, %v67_v12  ;;  %v43_v22 = vsel %vm42_vm1, %v37_v13, %v39_v19  ;;  %v44_v23 = vsel %vm42_vm1, %v39_v19, %v37_v13 }
  0x7a   :  { %v81_v24 = vmul.f32 %v76_v14, %v72_v21  ;;  %v53_v25 = vmul.f32 %v48_v15, %v44_v23  ;;  %v82_v26 = vmul.f32 %v80_v16, %v71_v20  ;;  %v54_v27 = vmul.f32 %v52_v17, %v43_v22 }
  0x7b   :  { %v963_v13 = vsub.s32 5, %v1859_v6 }
  0x7c   :  { %1724 = vmatprep.subr.msk.mxu0 %vm87_vm2, %v82_v26  ;;  %v61_v30 = vpop.permute.xlu1 %60  ;;  %1727 = vmatprep.subr.msk.mxu1 %vm87_vm2, %v54_v27  ;;  %v59_v31 = vpop.permute.xlu0 %58 }
  0x7d   :  { %v62_v32 = vsel %vm42_vm1, %v59_v31, %v61_v30  ;;  %v63_v33 = vsel %vm42_vm1, %v61_v30, %v59_v31  ;;  %1725 = vmatpush1.msk.msra.mxu0 %vm87_vm2, %v81_v24  ;;  %1728 = vmatpush1.msk.msra.mxu1 %vm87_vm2, %v53_v25  ;;  %v964_v22 = vrot.slane %v1868_v10, %v963_v13  ;;  %v23_v25 = vld [vmem:[%s2085_s0 + $0x10] sm:$0xf]  ;;  %v1149_v31 = vsub.s32 6, %v1859_v6 }
  0x7e   :  { %v64_v35 = vmul.f32 %v63_v33, %v48_v15  ;;  %v65_v36 = vmul.f32 %v62_v32, %v52_v17  ;;  %1729 = vmatmul.mubr.msk.f32.vlgmr.msra.gmra.mxu1 %vm83_vm3, %v19_v28  ;;  %1726 = vmatmul.mubr.msk.f32.vlgmr.msra.gmra.mxu0 %vm83_vm3, %v20_v29  ;;  %v874_v17 = vmul.f32 %v789_v55, %v1841_v3 }
  0x7f   :  { %323 = vmatprep.mubr.f32.mxu0 %v1793_v1  ;;  %400 = vmatprep.mubr.f32.mxu1 %v1793_v1  ;;  %v968_v3 = vrot.slane %v1873_v11, %v963_v13  ;;  %v1773_v13 = vld [vmem:[%s2084_s3 + $0x18] ss:$0 sm:$0xff] }
  0x80   :  { %v248_v38 = vpop.permute.xlu1 %247  ;;  %1733 = vmatprep.subr.msk.mxu1 %vm87_vm2, %v65_v36  ;;  %v246_v39 = vpop.permute.xlu0 %245  ;;  %v876_v26 = vcombine.high %v874_v17, %v874_v17 }
  0x81   :  { %v249_v40 = vsel %vm70_vm0, %v246_v39, %v248_v38  ;;  %v250_v41 = vsel %vm70_vm0, %v248_v38, %v246_v39  ;;  %1734 = vmatpush1.msk.msra.mxu1 %vm87_vm2, %v64_v35  ;;  %v1150_v39 = vrot.slane %v1868_v10, %v1149_v31 }
  0x82   :  { %v251_v44 = vmul.f32 %v250_v41, %v76_v14  ;;  %v252_v45 = vmul.f32 %v249_v40, %v80_v16  ;;  %1735 = vmatmul.mubr.msk.f32.vlgmr.msra.gmra.mxu1 %vm83_vm3, %v19_v28  ;;  %v22_v16 = vld [vmem:[%s2085_s0 + $0xc] sm:$0xf] }
  0x83   :  { %584 = vmatprep.mubr.f32.mxu1 %v1793_v1 }
  0x84   :  { %v410_v48 = vpop.permute.xlu1 %409  ;;  %1730 = vmatprep.subr.msk.mxu0 %vm87_vm2, %v252_v45  ;;  %v408_v49 = vpop.permute.xlu0 %407 }
  0x85   :  { %v412_v50 = vsel %vm411_vm4, %v408_v49, %v410_v48  ;;  %v413_v51 = vsel %vm411_vm4, %v410_v48, %v408_v49  ;;  %1731 = vmatpush1.msk.msra.mxu0 %vm87_vm2, %v251_v44  ;;  %v1335_v49 = vsub.s32 7, %v1859_v6 }
  0x86   :  { %v422_v53 = vmul.f32 %v417_v42, %v413_v51  ;;  %v423_v54 = vmul.f32 %v421_v43, %v412_v50  ;;  %1732 = vmatmul.mubr.msk.f32.vlgmr.msra.gmra.mxu0 %vm83_vm3, %v20_v29  ;;  %v25_v50 = vld [vmem:[%s2085_s0 + $0x18] sm:$0xf] }
  0x87   :  { %497 = vmatprep.mubr.f32.mxu0 %v1793_v1 }
  0x88   :  { %v509_v57 = vpop.permute.xlu1 %508  ;;  %v507_v58 = vpop.permute.xlu0 %506  ;;  %1736 = vmatprep.subr.msk.mxu0 %vm87_vm2, %v423_v54 }
  0x89   :  { %v510_v59 = vsel %vm411_vm4, %v507_v58, %v509_v57  ;;  %v511_v60 = vsel %vm411_vm4, %v509_v57, %v507_v58  ;;  %1737 = vmatpush1.msk.msra.mxu0 %vm87_vm2, %v422_v53  ;;  %v1340_v57 = vrot.slane %v1873_v11, %v1335_v49 }
  0x8a   :  { %v512_v62 = vmul.f32 %v511_v60, %v417_v42  ;;  %v513_v63 = vmul.f32 %v510_v59, %v421_v43  ;;  %1738 = vmatmul.mubr.msk.f32.vlgmr.msra.gmra.mxu0 %vm83_vm3, %v21_v56  ;;  %v1154_v42 = vrot.slane %v1873_v11, %v1149_v31 }
  0x8b   :  { %683 = vmatprep.mubr.f32.mxu0 %v1793_v1 }
  0x8c   :  { %v596_v5 = vpop.permute.xlu1 %595  ;;  %v594_v8 = vpop.permute.xlu0 %593  ;;  %1739 = vmatprep.subr.msk.mxu1 %vm87_vm2, %v513_v63 }
  0x8d   :  { %v598_v9 = vsel %vm597_vm5, %v594_v8, %v596_v5  ;;  %v599_v12 = vsel %vm597_vm5, %v596_v5, %v594_v8  ;;  %1740 = vmatpush1.msk.msra.mxu1 %vm87_vm2, %v512_v62 }
  0x8e   :  { %v608_v14 = vmul.f32 %v603_v61, %v599_v12  ;;  %v609_v15 = vmul.f32 %v607_v2, %v598_v9  ;;  %1741 = vmatmul.mubr.msk.f32.vlgmr.msra.gmra.mxu1 %vm83_vm3, %v21_v56  ;;  %v1336_v56 = vrot.slane %v1868_v10, %v1335_v49  ;;  %v26_v10 = vld [vmem:[%s2085_s0 + $0x1c] sm:$0xf]  ;;  %v1772_v12 = vld [vmem:[%s2084_s3 + $0x10] ss:$0 sm:$0xff] }
  0x8f   :  { %770 = vmatprep.mubr.f32.mxu1 %v1793_v1 }
  0x90   :  { %v695_v18 = vpop.permute.xlu1 %694  ;;  %v693_v19 = vpop.permute.xlu0 %692  ;;  %1742 = vmatprep.subr.msk.mxu0 %vm87_vm2, %v609_v15 }
  0x91   :  { %v696_v20 = vsel %vm597_vm5, %v693_v19, %v695_v18  ;;  %v697_v21 = vsel %vm597_vm5, %v695_v18, %v693_v19  ;;  %1743 = vmatpush1.msk.msra.mxu0 %vm87_vm2, %v608_v14  ;;  %v27_v19 = vld [vmem:[%s2085_s0 + $0x20] sm:$0xf] }
  0x92   :  { %v698_v23 = vmul.f32 %v697_v21, %v603_v61  ;;  %v699_v24 = vmul.f32 %v696_v20, %v607_v2  ;;  %1744 = vmatmul.mubr.msk.f32.vlgmr.msra.gmra.mxu0 %vm83_vm3, %v22_v16  ;;  %1748 = vmatprep.subr.msk.mxu0 %vm87_vm2, %v793_v0 }
  0x93   :  { %1749 = vmatpush1.msk.msra.mxu0 %vm87_vm2, %v791_v4  ;;  %865 = vmatprep.mubr.f32.mxu0 %v1793_v1 }
  0x94   :  { %v957_v27 = vpop.permute.xlu1 %956  ;;  %v955_v28 = vpop.permute.xlu0 %954  ;;  %1745 = vmatprep.subr.msk.mxu1 %vm87_vm2, %v699_v24 }
  0x95   :  { %v959_v29 = vsel %vm958_vm6, %v955_v28, %v957_v27  ;;  %v960_v30 = vsel %vm958_vm6, %v957_v27, %v955_v28  ;;  %1746 = vmatpush1.msk.msra.mxu1 %vm87_vm2, %v698_v23 }
  0x96   :  { %v969_v32 = vmul.f32 %v964_v22, %v959_v29  ;;  %v970_v33 = vmul.f32 %v968_v3, %v960_v30  ;;  %1747 = vmatmul.mubr.msk.f32.vlgmr.msra.gmra.mxu1 %vm83_vm3, %v22_v16  ;;  %1750 = vmatmul.mubr.msk.f32.vlgmr.msra.gmra.mxu0 %vm83_vm3, %v23_v25 }
  0x97   :  { %1751 = vmatprep.subr.msk.mxu1 %vm87_vm2, %v876_v26  ;;  %945 = vmatprep.mubr.f32.mxu1 %v1793_v1 }
  0x98   :  { %v1056_v35 = vpop.permute.xlu1 %1055  ;;  %v1054_v36 = vpop.permute.xlu0 %1053  ;;  %1754 = vmatprep.subr.msk.mxu0 %vm87_vm2, %v970_v33  ;;  %1752 = vmatpush1.msk.msra.mxu1 %vm87_vm2, %v874_v17 }
  0x99   :  { %v1057_v37 = vsel %vm958_vm6, %v1054_v36, %v1056_v35  ;;  %v1058_v38 = vsel %vm958_vm6, %v1056_v35, %v1054_v36  ;;  %1755 = vmatpush1.msk.msra.mxu0 %vm87_vm2, %v969_v32  ;;  %1044 = vmatprep.mubr.f32.mxu0 %v1793_v1 }
  0x9a   :  { %v1059_v40 = vmul.f32 %v1057_v37, %v964_v22  ;;  %v1060_v41 = vmul.f32 %v1058_v38, %v968_v3  ;;  %1753 = vmatmul.mubr.msk.f32.vlgmr.msra.gmra.mxu1 %vm83_vm3, %v23_v25  ;;  %1756 = vmatmul.mubr.msk.f32.vlgmr.msra.gmra.mxu0 %vm83_vm3, %v24_v34 }
  0x9b   :  { %1131 = vmatprep.mubr.f32.mxu1 %v1793_v1  ;;  %1230 = vmatprep.mubr.f32.mxu0 %v1793_v1 }
  0x9c   :  { %v1143_v43 = vpop.permute.xlu1 %1142  ;;  %v1141_v44 = vpop.permute.xlu0 %1140  ;;  %1757 = vmatprep.subr.msk.mxu1 %vm87_vm2, %v1060_v41 }
  0x9d   :  { %v1145_v45 = vsel %vm1144_vm7, %v1141_v44, %v1143_v43  ;;  %v1146_v46 = vsel %vm1144_vm7, %v1143_v43, %v1141_v44  ;;  %1758 = vmatpush1.msk.msra.mxu1 %vm87_vm2, %v1059_v40 }
  0x9e   :  { %v1155_v47 = vmul.f32 %v1150_v39, %v1145_v45  ;;  %v1156_v48 = vmul.f32 %v1154_v42, %v1146_v46  ;;  %1759 = vmatmul.mubr.msk.f32.vlgmr.msra.gmra.mxu1 %vm83_vm3, %v24_v34 }
  0x9f   :  { %1317 = vmatprep.mubr.f32.mxu1 %v1793_v1 }
  0xa0   :  { %v1242_v51 = vpop.permute.xlu1 %1241  ;;  %v1240_v52 = vpop.permute.xlu0 %1239  ;;  %1760 = vmatprep.subr.msk.mxu0 %vm87_vm2, %v1156_v48 }
  0xa1   :  { %v1243_v53 = vsel %vm1144_vm7, %v1240_v52, %v1242_v51  ;;  %v1244_v54 = vsel %vm1144_vm7, %v1242_v51, %v1240_v52  ;;  %1761 = vmatpush1.msk.msra.mxu0 %vm87_vm2, %v1155_v47 }
  0xa2   :  { %v1245_v6 = vmul.f32 %v1243_v53, %v1150_v39  ;;  %v1246_v55 = vmul.f32 %v1244_v54, %v1154_v42  ;;  %1762 = vmatmul.mubr.msk.f32.vlgmr.msra.gmra.mxu0 %vm83_vm3, %v25_v50 }
  0xa3   :  { %1416 = vmatprep.mubr.f32.mxu0 %v1793_v1 }
  0xa4   :  { %v1329_v58 = vpop.permute.xlu1 %1328  ;;  %v1327_v59 = vpop.permute.xlu0 %1326  ;;  %1763 = vmatprep.subr.msk.mxu1 %vm87_vm2, %v1246_v55 }
  0xa5   :  { %v1331_v60 = vsel %vm1330_vm8, %v1327_v59, %v1329_v58  ;;  %v1332_v61 = vsel %vm1330_vm8, %v1329_v58, %v1327_v59  ;;  %1764 = vmatpush1.msk.msra.mxu1 %vm87_vm2, %v1245_v6 }
  0xa6   :  { %v1341_v62 = vmul.f32 %v1336_v56, %v1331_v60  ;;  %v1342_v63 = vmul.f32 %v1340_v57, %v1332_v61  ;;  %1765 = vmatmul.mubr.msk.f32.vlgmr.msra.gmra.mxu1 %vm83_vm3, %v25_v50 }
  0xa7   :  { %1503 = vmatprep.mubr.f32.mxu1 %v1793_v1 }
  0xa8   :  { %v1428_v11 = vpop.permute.xlu1 %1427  ;;  %v1426_v2 = vpop.permute.xlu0 %1425  ;;  %1766 = vmatprep.subr.msk.mxu0 %vm87_vm2, %v1342_v63 }
  0xa9   :  { %v1429_v4 = vsel %vm1330_vm8, %v1426_v2, %v1428_v11  ;;  %v1430_v5 = vsel %vm1330_vm8, %v1428_v11, %v1426_v2  ;;  %1767 = vmatpush1.msk.msra.mxu0 %vm87_vm2, %v1341_v62 }
  0xaa   :  { %v1431_v8 = vmul.f32 %v1429_v4, %v1336_v56  ;;  %v1432_v9 = vmul.f32 %v1430_v5, %v1340_v57  ;;  %1768 = vmatmul.mubr.msk.f32.vlgmr.msra.gmra.mxu0 %vm83_vm3, %v26_v10 }
  0xab   :  { %1602 = vmatprep.mubr.f32.mxu0 %v1793_v1 }
  0xac   :  { %v1515_v14 = vpop.permute.xlu1 %1514  ;;  %v1513_v15 = vpop.permute.xlu0 %1512  ;;  %1769 = vmatprep.subr.msk.mxu1 %vm87_vm2, %v1432_v9  ;;  %v32_v9 = vld [vmem:[%s2086_s2] sm:$0xff] }
  0xad   :  { %v1517_v0 = vsel %vm1516_vm9, %v1513_v15, %v1515_v14  ;;  %v1518_v16 = vsel %vm1516_vm9, %v1515_v14, %v1513_v15  ;;  %1770 = vmatpush1.msk.msra.mxu1 %vm87_vm2, %v1431_v8 }
  0xae   :  { %v1527_v17 = vmul.f32 %v1772_v12, %v1517_v0  ;;  %v1528_v18 = vmul.f32 %v1773_v13, %v1518_v16  ;;  %1771 = vmatmul.mubr.msk.f32.vlgmr.msra.gmra.mxu1 %vm83_vm3, %v26_v10 }
  0xaf   :  { %1689 = vmatprep.mubr.f32.mxu1 %v1793_v1 }
  0xb0   :  { %v1614_v20 = vpop.permute.xlu1 %1613  ;;  %v1612_v21 = vpop.permute.xlu0 %1611  ;;  %1774 = vmatprep.subr.msk.mxu0 %vm87_vm2, %v1528_v18 }
  0xb1   :  { %v1615_v22 = vsel %vm1516_vm9, %v1612_v21, %v1614_v20  ;;  %v1616_v23 = vsel %vm1516_vm9, %v1614_v20, %v1612_v21  ;;  %1775 = vmatpush1.msk.msra.mxu0 %vm87_vm2, %v1527_v17  ;;  %v1699_v17 = vcombine.high %v32_v9, %v32_v9 }
  0xb2   :  { %v1617_v24 = vmul.f32 %v1772_v12, %v1615_v22  ;;  %v1618_v3 = vmul.f32 %v1773_v13, %v1616_v23  ;;  %1776 = vmatmul.mubr.msk.f32.vlgmr.msra.gmra.mxu0 %vm83_vm3, %v27_v19 }
  0xb4   :  { %1777 = vmatprep.subr.msk.mxu1 %vm87_vm2, %v1618_v3 }
  0xb5   :  { %1778 = vmatpush1.msk.msra.mxu1 %vm87_vm2, %v1617_v24 }
  0xb6   :  { %1779 = vmatmul.mubr.msk.f32.vlgmr.msra.gmra.mxu1 %vm83_vm3, %v27_v19 }
 0x13e   :  { %v160_v1 = vpop.f32.mrf.mxu0  ;;  %v240_v25 = vpop.f32.mrf.mxu1 }
 0x13f   :  { %v241_v42 = vadd.f32 %v240_v25, %v160_v1 }
 0x140   :  { %v162_v26 = vpop.f32.mrf.mxu0  ;;  %v242_v27 = vpop.f32.mrf.mxu1 }
 0x141   :  { %v243_v43 = vadd.f32 %v242_v27, %v162_v26 }
 0x142   :  { %v402_v29 = vpop.f32.mrf.mxu1 }
 0x144   :  { %v404_v31 = vpop.f32.mrf.mxu1 }
 0x146   :  { %v325_v28 = vpop.f32.mrf.mxu0 }
 0x147   :  { %v403_v46 = vadd.f32 %v402_v29, %v325_v28 }
 0x148   :  { %v327_v7 = vpop.f32.mrf.mxu0 }
 0x149   :  { %v405_v48 = vadd.f32 %v404_v31, %v327_v7 }
 0x14a   :  { %v499_v30 = vpop.f32.mrf.mxu0 }
 0x14b   :  { %v504_v47 = vadd.f32 %v499_v30, %v241_v42 }
 0x14c   :  { %v501_v32 = vpop.f32.mrf.mxu0 }
 0x14d   :  { %v505_v49 = vadd.f32 %v501_v32, %v243_v43 }
 0x14e   :  { %v586_v33 = vpop.f32.mrf.mxu1 }
 0x14f   :  { %v591_v52 = vadd.f32 %v586_v33, %v403_v46 }
 0x150   :  { %v588_v35 = vpop.f32.mrf.mxu1 }
 0x151   :  { %v592_v6 = vadd.f32 %v588_v35, %v405_v48 }
 0x152   :  { %v685_v34 = vpop.f32.mrf.mxu0 }
 0x153   :  { %v690_v53 = vadd.f32 %v685_v34, %v504_v47 }
 0x154   :  { %v687_v36 = vpop.f32.mrf.mxu0 }
 0x155   :  { %v691_v55 = vadd.f32 %v687_v36, %v505_v49 }
 0x156   :  { %v772_v37 = vpop.f32.mrf.mxu1  ;;  %v867_v38 = vpop.f32.mrf.mxu0 }
 0x157   :  { %v777_v57 = vadd.f32 %v772_v37, %v591_v52  ;;  %v872_v58 = vadd.f32 %v867_v38, %v690_v53 }
 0x158   :  { %v774_v39 = vpop.f32.mrf.mxu1  ;;  %v869_v40 = vpop.f32.mrf.mxu0 }
 0x159   :  { %v778_v61 = vadd.f32 %v774_v39, %v592_v6  ;;  %v873_v62 = vadd.f32 %v869_v40, %v691_v55 }
 0x15a   :  { %v947_v41 = vpop.f32.mrf.mxu1  ;;  %v1046_v44 = vpop.f32.mrf.mxu0 }
 0x15b   :  { %v952_v10 = vadd.f32 %v947_v41, %v777_v57  ;;  %v1051_v11 = vadd.f32 %v1046_v44, %v872_v58 }
 0x15c   :  { %v949_v45 = vpop.f32.mrf.mxu1  ;;  %v1048_v50 = vpop.f32.mrf.mxu0 }
 0x15d   :  { %v953_v4 = vadd.f32 %v949_v45, %v778_v61  ;;  %v1052_v5 = vadd.f32 %v1048_v50, %v873_v62 }
 0x15e   :  { %v1133_v51 = vpop.f32.mrf.mxu1 }
 0x15f   :  { %v1138_v14 = vadd.f32 %v1133_v51, %v952_v10 }
 0x160   :  { %v1135_v56 = vpop.f32.mrf.mxu1 }
 0x161   :  { %v1139_v18 = vadd.f32 %v1135_v56, %v953_v4 }
 0x162   :  { %v1232_v54 = vpop.f32.mrf.mxu0 }
 0x163   :  { %v1237_v8 = vadd.f32 %v1232_v54, %v1051_v11 }
 0x164   :  { %v1234_v59 = vpop.f32.mrf.mxu0 }
 0x165   :  { %v1238_v15 = vadd.f32 %v1234_v59, %v1052_v5 }
 0x166   :  { %v1319_v60 = vpop.f32.mrf.mxu1 }
 0x167   :  { %v1324_v19 = vadd.f32 %v1319_v60, %v1138_v14 }
 0x168   :  { %v1321_v2 = vpop.f32.mrf.mxu1 }
 0x169   :  { %v1325_v24 = vadd.f32 %v1321_v2, %v1139_v18 }
 0x16a   :  { %v1418_v63 = vpop.f32.mrf.mxu0 }
 0x16b   :  { %v1423_v0 = vadd.f32 %v1418_v63, %v1237_v8 }
 0x16c   :  { %v1420_v12 = vpop.f32.mrf.mxu0 }
 0x16d   :  { %v1424_v20 = vadd.f32 %v1420_v12, %v1238_v15 }
 0x16e   :  { %v1505_v13 = vpop.f32.mrf.mxu1 }
 0x16f   :  { %v1510_v3 = vadd.f32 %v1505_v13, %v1324_v19 }
 0x170   :  { %v1507_v22 = vpop.f32.mrf.mxu1 }
 0x171   :  { %v1511_v27 = vadd.f32 %v1507_v22, %v1325_v24 }
 0x172   :  { %v1604_v16 = vpop.f32.mrf.mxu0 }
 0x173   :  { %v1609_v21 = vadd.f32 %v1604_v16, %v1423_v0 }
 0x174   :  { %v1606_v23 = vpop.f32.mrf.mxu0 }
 0x175   :  { %v1701_v1 = vadd.f32 %v1609_v21, %v32_v9  ;;  %v1610_v25 = vadd.f32 %v1606_v23, %v1424_v20 }
 0x176   :  { %v1691_v26 = vpop.f32.mrf.mxu1 }
 0x177   :  { %v1702_v28 = vadd.f32 %v1699_v17, %v1610_v25  ;;  %v1696_v29 = vadd.f32 %v1691_v26, %v1510_v3  ;;  %v1703_v30 = vmax.f32 %v1701_v1, 0.0 }
 0x178   :  { %v1693_v7 = vpop.f32.mrf.mxu1 }
 0x179   :  { %v1704_v31 = vmax.f32 %v1702_v28, 0.0  ;;  %v1710_v32 = vadd.f32 %v1696_v29, %v32_v9  ;;  %v1697_v33 = vadd.f32 %v1693_v7, %v1511_v27 }
 0x17b   :  { %v1707_v34 = vcombine.low %v1703_v30, %v1704_v31  ;;  %v1711_v35 = vadd.f32 %v1699_v17, %v1697_v33  ;;  %v1712_v36 = vmax.f32 %v1710_v32, 0.0 }
 0x17d   :  { %1709 = vst [vmem:[%s2087_s4] sm:$0xff] %v1707_v34  ;;  %v1713_v37 = vmax.f32 %v1711_v35, 0.0 }
 0x17f   :  { %v1716_v38 = vcombine.low %v1712_v36, %v1713_v37 }
 0x181   :  { %1780 = vst [vmem:[%s2087_s4 + $0x8] sm:$0xff] %v1716_v38 }

</bundles_post_ra>
